<compile_context>
chip_gen: v7x
topology: tpu7x:2x2x1
jax: 0.10.0
libtpu: 0.0.40
codegen_flags: <defaults>
</compile_context>

<pallas_src>
import jax
import jax.numpy as jnp
from jax.experimental import pallas as pl
from jax.experimental.pallas import tpu as pltpu

HIDDEN_PAD = 128   # lane-dense padded hidden width (real hidden = 30)
OUT_PAD = 128      # lane-dense padded output width (real nb_action is tiny)
SMALL_BATCH_MAX = 1024  # below this, run the whole batch as a single tile


def mlp_kernel(x_ref, w1_ref, b1_ref, w2_ref, b2_ref, o_ref):
    """One (TB, ...) batch tile of q = relu(x @ w1 + b1) @ w2 + b2."""
    x = x_ref[...]                         # (TB, in_sz)        streamed
    # Layer 1: K = in_sz (tiny) -> still MXU; the vext slot is otherwise idle
    # and this keeps VALU/XLU free for the bias add + ReLU.
    h = jnp.dot(x, w1_ref[...], preferred_element_type=jnp.float32) + b1_ref[...]
    h = jnp.maximum(h, 0.0)                # ReLU
    # Layer 2: lane-dense 128x128 MXU matmul.
    q = jnp.dot(h, w2_ref[...], preferred_element_type=jnp.float32) + b2_ref[...]
    o_ref[...] = q.astype(o_ref.dtype)     # lane-dense (TB, 128) unmasked store


def prepare_params(w1, b1, w2, b2):
    """Pad params once to lane-dense widths (call once per weight update).

    w1: (input_size, 30), b1: (1, 30) or (30,)
    w2: (30, nb_action),  b2: (1, nb_action) or (nb_action,)
    Returns the four padded arrays used by `network_forward`.
    """
    in_sz, hidden = w1.shape
    nb_action = w2.shape[1]
    f32 = jnp.float32
    w1p = jnp.zeros((in_sz, HIDDEN_PAD), f32).at[:, :hidden].set(w1.astype(f32))
    b1p = jnp.zeros((1, HIDDEN_PAD), f32).at[:, :hidden].set(
        jnp.asarray(b1).reshape(1, hidden).astype(f32))
    w2p = jnp.zeros((HIDDEN_PAD, OUT_PAD), f32).at[:hidden, :nb_action].set(
        w2.astype(f32))
    b2p = jnp.zeros((1, OUT_PAD), f32).at[:, :nb_action].set(
        jnp.asarray(b2).reshape(1, nb_action).astype(f32))
    return (w1p, b1p, w2p, b2p)


def _round_up(x, m):
    return ((x + m - 1) // m) * m


def _select_tile(B, block_b):
    """Pick a batch tile size (always a multiple of 8)."""
    block_b = _round_up(max(int(block_b), 8), 8)   # defensive: 8-align caller value
    if B <= SMALL_BATCH_MAX or B <= block_b:
        # Small-batch fast path: one tile, one input DMA, one output DMA.
        return _round_up(B, 8)
    # Multi-tile path: prefer an even tile count so the "parallel" batch axis
    # splits evenly across v7x's two TensorCores.
    tb = block_b
    n_tiles = pl.cdiv(B, tb)
    if n_tiles > 1 and n_tiles % 2 == 1:
        n_tiles += 1
        tb = _round_up(pl.cdiv(B, n_tiles), 8)
    return tb


def network_forward(state, padded_params, *, nb_action, block_b=512):
    """Pallas implementation of Network.forward.

    state: (B, input_size) f32
    padded_params: output of `prepare_params` (padded once, reused per call)
    returns (B, nb_action) f32
    """
    w1p, b1p, w2p, b2p = padded_params
    B, in_sz = state.shape
    f32 = jnp.float32

    TB = _select_tile(B, block_b)
    grid = (pl.cdiv(B, TB),)   # ragged last block handled by Pallas (pad-on-read,
                               # OOB rows dropped on write; no cross-row reduction)

    flops = 2 * B * (in_sz * HIDDEN_PAD + HIDDEN_PAD * OUT_PAD)
    bytes_accessed = 4 * (
        B * in_sz                             # activation stream in
        + in_sz * HIDDEN_PAD + HIDDEN_PAD     # fc1 params (read once, resident)
        + HIDDEN_PAD * OUT_PAD + OUT_PAD      # fc2 params (read once, resident)
        + B * OUT_PAD                         # output slab
    )

    out_padded = pl.pallas_call(
        mlp_kernel,
        out_shape=jax.ShapeDtypeStruct((B, OUT_PAD), f32),
        grid=grid,
        in_specs=[
            pl.BlockSpec((TB, in_sz), lambda i: (i, 0)),           # streamed x
            pl.BlockSpec((in_sz, HIDDEN_PAD), lambda i: (0, 0)),   # resident w1
            pl.BlockSpec((1, HIDDEN_PAD), lambda i: (0, 0)),       # resident b1
            pl.BlockSpec((HIDDEN_PAD, OUT_PAD), lambda i: (0, 0)), # resident w2
            pl.BlockSpec((1, OUT_PAD), lambda i: (0, 0)),          # resident b2
        ],
        out_specs=pl.BlockSpec((TB, OUT_PAD), lambda i: (i, 0)),
        compiler_params=pltpu.CompilerParams(
            # Batch tiles are independent -> shard across TCs on v7x megacore.
            dimension_semantics=("parallel",),
        ),
        cost_estimate=pl.CostEstimate(
            flops=flops, transcendentals=0, bytes_accessed=bytes_accessed),
    )(state.astype(f32), w1p, b1p, w2p, b2p)

    # Strip lane padding; inside a jit this slices/fuses into the consumer.
    return out_padded[:, :nb_action]


def init_params(key, input_size, nb_action, hidden=30):
    """Deterministic init mirroring nn.Linear default (uniform +/- 1/sqrt(fan_in))."""
    k1, k2, k3, k4 = jax.random.split(key, 4)
    bound1 = 1.0 / jnp.sqrt(input_size)
    bound2 = 1.0 / jnp.sqrt(hidden)
    # Stored transposed relative to PyTorch: (in_features, out_features).
    w1 = jax.random.uniform(k1, (input_size, hidden), jnp.float32, -bound1, bound1)
    b1 = jax.random.uniform(k2, (1, hidden), jnp.float32, -bound1, bound1)
    w2 = jax.random.uniform(k3, (hidden, nb_action), jnp.float32, -bound2, bound2)
    b2 = jax.random.uniform(k4, (1, nb_action), jnp.float32, -bound2, bound2)
    return w1, b1, w2, b2


if __name__ == "__main__":
    input_size = 5     # e.g. Kivy self-driving-car sensor state
    nb_action = 3

    key = jax.random.PRNGKey(0)
    kp, kx1, kx2 = jax.random.split(key, 3)
    w1, b1, w2, b2 = init_params(kp, input_size, nb_action)

    # Pad weights ONCE (not per forward call).
    params = prepare_params(w1, b1, w2, b2)

    fwd = jax.jit(
        lambda s, p: network_forward(s, p, nb_action=nb_action, block_b=512))

    def ref(s):
        return jnp.maximum(s @ w1 + b1, 0.0) @ w2 + b2

    # 1) small-batch fast path: single tile, ragged (B not multiple of 8).
    batch_small = 200
    state_small = jax.random.normal(kx1, (batch_small, input_size), jnp.float32)
    q_small = jax.block_until_ready(fwd(state_small, params))
    assert q_small.shape == (batch_small, nb_action)
    assert jnp.allclose(q_small, ref(state_small), atol=1e-5, rtol=1e-5)

    # 2) multi-tile path: even tile count + ragged last block via cdiv grid.
    batch_large = 1300
    state_large = jax.random.normal(kx2, (batch_large, input_size), jnp.float32)
    q_large = jax.block_until_ready(fwd(state_large, params))
    assert q_large.shape == (batch_large, nb_action)
    assert jnp.allclose(q_large, ref(state_large), atol=1e-5, rtol=1e-5)

    print("KERNEL_OK")
</pallas_src>

<mosaic_0001>
module attributes {stable_mosaic.version = 11 : i64} {
  func.func @mlp_kernel(%arg0: i32, %arg1: memref<200x5xf32, #tpu.memory_space<vmem>>, %arg2: memref<5x128xf32, #tpu.memory_space<vmem>>, %arg3: memref<1x128xf32, #tpu.memory_space<vmem>>, %arg4: memref<128x128xf32, #tpu.memory_space<vmem>>, %arg5: memref<1x128xf32, #tpu.memory_space<vmem>>, %arg6: memref<200x128xf32, #tpu.memory_space<vmem>>) attributes {dimension_semantics = [#tpu.dimension_semantics<parallel>], iteration_bounds = array<i64: 1>, scalar_prefetch = 0 : i64, scratch_operands = 0 : i64, tpu.core_type = #tpu.core_type<tc>, window_params = [{transform_indices = @transform_0, window_bounds = array<i64: 200, 5>}, {pipeline_mode = #tpu.pipeline_mode<synchronous>, transform_indices = @transform_1, window_bounds = array<i64: 5, 128>}, {pipeline_mode = #tpu.pipeline_mode<synchronous>, transform_indices = @transform_2, window_bounds = array<i64: 1, 128>}, {pipeline_mode = #tpu.pipeline_mode<synchronous>, transform_indices = @transform_3, window_bounds = array<i64: 128, 128>}, {pipeline_mode = #tpu.pipeline_mode<synchronous>, transform_indices = @transform_4, window_bounds = array<i64: 1, 128>}, {transform_indices = @transform_5, window_bounds = array<i64: 200, 128>}]} {
    %c0 = arith.constant 0 : index
    %c0_0 = arith.constant 0 : index
    %0 = vector.load %arg1[%c0, %c0_0] : memref<200x5xf32, #tpu.memory_space<vmem>>, vector<200x5xf32>
    %c0_1 = arith.constant 0 : index
    %c0_2 = arith.constant 0 : index
    %1 = vector.load %arg2[%c0_1, %c0_2] : memref<5x128xf32, #tpu.memory_space<vmem>>, vector<5x128xf32>
    %cst = arith.constant dense<0.000000e+00> : vector<200x128xf32>
    %2 = tpu.matmul %0, %1, %cst {dimension_numbers = #tpu.dot_dimension_numbers<[1], [0], [0], [1], [0, 0, 1, 1], [], []>} : vector<200x5xf32>, vector<5x128xf32>, vector<200x128xf32> -> vector<200x128xf32>
    %c0_3 = arith.constant 0 : index
    %c0_4 = arith.constant 0 : index
    %3 = vector.load %arg3[%c0_3, %c0_4] : memref<1x128xf32, #tpu.memory_space<vmem>>, vector<1x128xf32>
    %4 = vector.broadcast %3 : vector<1x128xf32> to vector<200x128xf32>
    %5 = arith.addf %2, %4 : vector<200x128xf32>
    %cst_5 = arith.constant 0.000000e+00 : f32
    %6 = vector.broadcast %cst_5 : f32 to vector<200x128xf32>
    %7 = arith.maximumf %5, %6 : vector<200x128xf32>
    %c0_6 = arith.constant 0 : index
    %c0_7 = arith.constant 0 : index
    %8 = vector.load %arg4[%c0_6, %c0_7] : memref<128x128xf32, #tpu.memory_space<vmem>>, vector<128x128xf32>
    %cst_8 = arith.constant dense<0.000000e+00> : vector<200x128xf32>
    %9 = tpu.matmul %7, %8, %cst_8 {dimension_numbers = #tpu.dot_dimension_numbers<[1], [0], [0], [1], [0, 0, 1, 1], [], []>} : vector<200x128xf32>, vector<128x128xf32>, vector<200x128xf32> -> vector<200x128xf32>
    %c0_9 = arith.constant 0 : index
    %c0_10 = arith.constant 0 : index
    %10 = vector.load %arg5[%c0_9, %c0_10] : memref<1x128xf32, #tpu.memory_space<vmem>>, vector<1x128xf32>
    %11 = vector.broadcast %10 : vector<1x128xf32> to vector<200x128xf32>
    %12 = arith.addf %9, %11 : vector<200x128xf32>
    %c0_11 = arith.constant 0 : index
    %c0_12 = arith.constant 0 : index
    %13 = vector.load %arg6[%c0_11, %c0_12] : memref<200x128xf32, #tpu.memory_space<vmem>>, vector<200x128xf32>
    tpu.vector_store %arg6[%c0_11, %c0_12], %12 {strides = array<i32>} : memref<200x128xf32, #tpu.memory_space<vmem>>, vector<200x128xf32>,
    return
  }
  func.func @transform_0(%arg0: i32) -> (i32, i32) {
    %c0_i32 = arith.constant 0 : i32
    %c0_i32_0 = arith.constant 0 : i32
    return %arg0, %c0_i32 : i32, i32
  }
  func.func @transform_1(%arg0: i32) -> (i32, i32) {
    %c0_i32 = arith.constant 0 : i32
    %c0_i32_0 = arith.constant 0 : i32
    %c0_i32_1 = arith.constant 0 : i32
    return %c0_i32, %c0_i32_0 : i32, i32
  }
  func.func @transform_2(%arg0: i32) -> (i32, i32) {
    %c0_i32 = arith.constant 0 : i32
    %c0_i32_0 = arith.constant 0 : i32
    %c0_i32_1 = arith.constant 0 : i32
    return %c0_i32, %c0_i32_0 : i32, i32
  }
  func.func @transform_3(%arg0: i32) -> (i32, i32) {
    %c0_i32 = arith.constant 0 : i32
    %c0_i32_0 = arith.constant 0 : i32
    %c0_i32_1 = arith.constant 0 : i32
    return %c0_i32, %c0_i32_0 : i32, i32
  }
  func.func @transform_4(%arg0: i32) -> (i32, i32) {
    %c0_i32 = arith.constant 0 : i32
    %c0_i32_0 = arith.constant 0 : i32
    %c0_i32_1 = arith.constant 0 : i32
    return %c0_i32, %c0_i32_0 : i32, i32
  }
  func.func @transform_5(%arg0: i32) -> (i32, i32) {
    %c0_i32 = arith.constant 0 : i32
    %c0_i32_0 = arith.constant 0 : i32
    return %arg0, %c0_i32 : i32, i32
  }
}

</mosaic_0001>

<bundles_post_ra>
// kernel: _lambda_.1
= control target key start
LH: loop header
LB: loop body
LE: loop exit
PB: predicated region body
PF: predicated region fallthrough
CT: control target
= control target key end

     0   :  { %vm129_vm0 = vcmask 1044480   ;;  %vm53_vm1 = vcmask 39936   ;;  %v912_v0 = vmov 0.0   ;;  %vm913_vm2 = vmmov 0   ;;  %s1348_s1 = inlined_call_operand.vmem [shape: f32[5,128], index: 1, kind: input, shape index: {}]   ;;  %s1349_s0 = inlined_call_operand.vmem [shape: f32[200,5], index: 0, kind: input, shape index: {}]   ;;  %s1350_s3 = inlined_call_operand.vmem [shape: f32[128,128], index: 3, kind: input, shape index: {}]   ;;  %s1351_s2 = inlined_call_operand.vmem [shape: f32[1,128], index: 2, kind: input, shape index: {}]   ;;  %s1352_s4 = inlined_call_operand.vmem [shape: f32[1,128], index: 4, kind: input, shape index: {}]   ;;  %s1353_s5 = inlined_call_operand.vmem [shape: f32[200,128], index: 5, kind: output, shape index: {}]  }
   0x1   :  { %685 = vmatprep.subr.mxu0 %v912_v0  ;;  %v45_v1 = vld [vmem:[%s1348_s1] sm:$0x1f]  ;;  %687 = vmatprep.mubr.msk.f32.mxu0 %vm913_vm2, %v912_v0  ;;  %v914_v3 = vmov 0.0|0.0   ;;  %v21_v4 = vld [vmem:[%s1349_s0 + $0x8] sm:$0xff]  ;;  %v22_v5 = vld [vmem:[%s1349_s0 + $0x10] sm:$0xff] }
   0x2   :  { %v20_v2 = vld [vmem:[%s1349_s0] sm:$0xff]  ;;  %686 = vmatpush3.msk.msra.mxu0 %vm129_vm0, %v45_v1  ;;  %893 = vmatprep.subr.bf16.mxu1 %v914_v3  ;;  %v349_v7 = vld [vmem:[%s1350_s3 + $0x8] sm:$0xff]  ;;  %v350_v8 = vld [vmem:[%s1350_s3 + $0x10] sm:$0xff] }
   0x3   :  { %688 = vmatmul.mubr.msk.f32.vlgmr.msra.gmra.mrb[0].mxu0 %vm53_vm1, %v20_v2  ;;  %869 = vmatprep.subr.bf16.mxu0 %v914_v3  ;;  %v348_v6 = vld [vmem:[%s1350_s3] sm:$0xff]  ;;  %v351_v9 = vld [vmem:[%s1350_s3 + $0x18] sm:$0xff]  ;;  %v353_v14 = vld [vmem:[%s1350_s3 + $0x28] sm:$0xff] }
   0x4   :  { %690 = vmatprep.mubr.msk.f32.mxu0 %vm913_vm2, %v912_v0  ;;  %803 = vmatprep.mubr.msk.f32.mxu1 %vm913_vm2, %v912_v0  ;;  %v870_v10 = vpack.c.bf16 %v349_v7, %v348_v6  ;;  %v23_v11 = vld [vmem:[%s1349_s0 + $0x18] sm:$0xff]  ;;  %v873_v12 = vpack.c.bf16 %v351_v9, %v350_v8  ;;  %v352_v13 = vld [vmem:[%s1350_s3 + $0x20] sm:$0xff]  ;;  %v354_v17 = vld [vmem:[%s1350_s3 + $0x30] sm:$0xff] }
   0x5   :  { %v24_v15 = vld [vmem:[%s1349_s0 + $0x20] sm:$0xff]  ;;  %v876_v16 = vpack.c.bf16 %v353_v14, %v352_v13  ;;  %v355_v18 = vld [vmem:[%s1350_s3 + $0x38] sm:$0xff]  ;;  %v25_v19 = vld [vmem:[%s1349_s0 + $0x28] sm:$0xff] }
   0x6   :  { %871 = vmatpush3.bf16.msra.mxu0 %v870_v10  ;;  %901 = vmatpush3.bf16.msra.mxu1 %v870_v10  ;;  %v879_v20 = vpack.c.bf16 %v355_v18, %v354_v17  ;;  %v356_v21 = vld [vmem:[%s1350_s3 + $0x40] sm:$0xff]  ;;  %v357_v22 = vld [vmem:[%s1350_s3 + $0x48] sm:$0xff]  ;;  %v26_v23 = vld [vmem:[%s1349_s0 + $0x30] sm:$0xff] }
   0x7   :  { %691 = vmatmul.mubr.msk.f32.gmra.mrb[2].mxu0 %vm53_vm1, %v21_v4  ;;  %872 = vmatprep.subr.bf16.mxu0 %v914_v3  ;;  %v882_v24 = vpack.c.bf16 %v357_v22, %v356_v21  ;;  %v358_v25 = vld [vmem:[%s1350_s3 + $0x50] sm:$0xff]  ;;  %v359_v26 = vld [vmem:[%s1350_s3 + $0x58] sm:$0xff]  ;;  %v360_v29 = vld [vmem:[%s1350_s3 + $0x60] sm:$0xff] }
   0x8   :  { %693 = vmatprep.mubr.msk.f32.mxu0 %vm913_vm2, %v912_v0  ;;  %894 = vmatprep.subr.bf16.mxu1 %v914_v3  ;;  %v27_v27 = vld [vmem:[%s1349_s0 + $0x38] sm:$0xff]  ;;  %v885_v28 = vpack.c.bf16 %v359_v26, %v358_v25  ;;  %v361_v30 = vld [vmem:[%s1350_s3 + $0x68] sm:$0xff]  ;;  %v28_v31 = vld [vmem:[%s1349_s0 + $0x40] sm:$0xff] }
   0x9   :  { %v888_v32 = vpack.c.bf16 %v361_v30, %v360_v29  ;;  %v29_v33 = vld [vmem:[%s1349_s0 + $0x48] sm:$0xff]  ;;  %v30_v34 = vld [vmem:[%s1349_s0 + $0x50] sm:$0xff]  ;;  %v31_v35 = vld [vmem:[%s1349_s0 + $0x58] sm:$0xff] }
   0xa   :  { %874 = vmatpush3.bf16.msra.mxu0 %v873_v12  ;;  %902 = vmatpush3.bf16.msra.mxu1 %v873_v12  ;;  %v32_v36 = vld [vmem:[%s1349_s0 + $0x60] sm:$0xff]  ;;  %v33_v37 = vld [vmem:[%s1349_s0 + $0x68] sm:$0xff]  ;;  %v34_v38 = vld [vmem:[%s1349_s0 + $0x70] sm:$0xff] }
   0xb   :  { %694 = vmatmul.mubr.msk.f32.gmra.mrb[4].mxu0 %vm53_vm1, %v22_v5  ;;  %875 = vmatprep.subr.bf16.mxu0 %v914_v3  ;;  %v35_v39 = vld [vmem:[%s1349_s0 + $0x78] sm:$0xff]  ;;  %v36_v40 = vld [vmem:[%s1349_s0 + $0x80] sm:$0xff]  ;;  %v37_v41 = vld [vmem:[%s1349_s0 + $0x88] sm:$0xff] }
   0xc   :  { %696 = vmatprep.mubr.msk.f32.mxu0 %vm913_vm2, %v912_v0  ;;  %895 = vmatprep.subr.bf16.mxu1 %v914_v3  ;;  %v38_v42 = vld [vmem:[%s1349_s0 + $0x90] sm:$0xff]  ;;  %v39_v43 = vld [vmem:[%s1349_s0 + $0x98] sm:$0xff]  ;;  %v40_v44 = vld [vmem:[%s1349_s0 + $0xa0] sm:$0xff] }
   0xd   :  { %v41_v45 = vld [vmem:[%s1349_s0 + $0xa8] sm:$0xff]  ;;  %v362_v46 = vld [vmem:[%s1350_s3 + $0x70] sm:$0xff]  ;;  %v363_v47 = vld [vmem:[%s1350_s3 + $0x78] sm:$0xff] }
   0xe   :  { %877 = vmatpush3.bf16.msra.mxu0 %v876_v16  ;;  %903 = vmatpush3.bf16.msra.mxu1 %v876_v16  ;;  %v891_v48 = vpack.c.bf16 %v363_v47, %v362_v46  ;;  %v42_v49 = vld [vmem:[%s1349_s0 + $0xb0] sm:$0xff]  ;;  %v43_v50 = vld [vmem:[%s1349_s0 + $0xb8] sm:$0xff]  ;;  %v44_v51 = vld [vmem:[%s1349_s0 + $0xc0] sm:$0xff] }
   0xf   :  { %697 = vmatmul.mubr.msk.f32.gmra.mrb[6].mxu0 %vm53_vm1, %v23_v11  ;;  %878 = vmatprep.subr.bf16.mxu0 %v914_v3  ;;  %v1170_v52 = vld [vmem:[%s1351_s2] ss:$0 sm:$0xff] }
  0x10   :  { %699 = vmatprep.mubr.msk.f32.mxu0 %vm913_vm2, %v912_v0  ;;  %896 = vmatprep.subr.bf16.mxu1 %v914_v3 }
  0x12   :  { %880 = vmatpush3.bf16.msra.mxu0 %v879_v20  ;;  %904 = vmatpush3.bf16.msra.mxu1 %v879_v20 }
  0x13   :  { %700 = vmatmul.mubr.msk.f32.gmra.mrb[8].mxu0 %vm53_vm1, %v24_v15  ;;  %881 = vmatprep.subr.bf16.mxu0 %v914_v3 }
  0x14   :  { %702 = vmatprep.mubr.msk.f32.mxu0 %vm913_vm2, %v912_v0  ;;  %897 = vmatprep.subr.bf16.mxu1 %v914_v3 }
  0x16   :  { %883 = vmatpush3.bf16.msra.mxu0 %v882_v24  ;;  %905 = vmatpush3.bf16.msra.mxu1 %v882_v24 }
  0x17   :  { %703 = vmatmul.mubr.msk.f32.gmra.mrb[10].mxu0 %vm53_vm1, %v25_v19  ;;  %884 = vmatprep.subr.bf16.mxu0 %v914_v3 }
  0x18   :  { %705 = vmatprep.mubr.msk.f32.mxu0 %vm913_vm2, %v912_v0  ;;  %898 = vmatprep.subr.bf16.mxu1 %v914_v3 }
  0x1a   :  { %886 = vmatpush3.bf16.msra.mxu0 %v885_v28  ;;  %906 = vmatpush3.bf16.msra.mxu1 %v885_v28 }
  0x1b   :  { %706 = vmatmul.mubr.msk.f32.gmra.mrb[12].mxu0 %vm53_vm1, %v26_v23  ;;  %887 = vmatprep.subr.bf16.mxu0 %v914_v3 }
  0x1c   :  { %708 = vmatprep.mubr.msk.f32.mxu0 %vm913_vm2, %v912_v0  ;;  %899 = vmatprep.subr.bf16.mxu1 %v914_v3 }
  0x1e   :  { %889 = vmatpush3.bf16.msra.mxu0 %v888_v32  ;;  %907 = vmatpush3.bf16.msra.mxu1 %v888_v32 }
  0x1f   :  { %709 = vmatmul.mubr.msk.f32.gmra.mrb[14].mxu0 %vm53_vm1, %v27_v27  ;;  %890 = vmatprep.subr.bf16.mxu0 %v914_v3 }
  0x20   :  { %711 = vmatprep.mubr.msk.f32.mxu0 %vm913_vm2, %v912_v0  ;;  %900 = vmatprep.subr.bf16.mxu1 %v914_v3 }
  0x22   :  { %892 = vmatpush3.bf16.msra.mxu0 %v891_v48  ;;  %908 = vmatpush3.bf16.msra.mxu1 %v891_v48 }
  0x23   :  { %712 = vmatmul.mubr.msk.f32.gmra.mrb[16].mxu0 %vm53_vm1, %v28_v31 }
  0x24   :  { %714 = vmatprep.mubr.msk.f32.mxu0 %vm913_vm2, %v912_v0 }
  0x27   :  { %715 = vmatmul.mubr.msk.f32.gmra.mrb[18].mxu0 %vm53_vm1, %v29_v33 }
  0x28   :  { %717 = vmatprep.mubr.msk.f32.mxu0 %vm913_vm2, %v912_v0 }
  0x2b   :  { %718 = vmatmul.mubr.msk.f32.gmra.mrb[20].mxu0 %vm53_vm1, %v30_v34 }
  0x2c   :  { %720 = vmatprep.mubr.msk.f32.mxu0 %vm913_vm2, %v912_v0 }
  0x2f   :  { %721 = vmatmul.mubr.msk.f32.gmra.mrb[22].mxu0 %vm53_vm1, %v31_v35 }
  0x30   :  { %723 = vmatprep.mubr.msk.f32.mxu0 %vm913_vm2, %v912_v0 }
  0x33   :  { %724 = vmatmul.mubr.msk.f32.gmra.mrb[24].mxu0 %vm53_vm1, %v32_v36 }
  0x34   :  { %726 = vmatprep.mubr.msk.f32.mxu0 %vm913_vm2, %v912_v0 }
  0x37   :  { %727 = vmatmul.mubr.msk.f32.gmra.mrb[26].mxu0 %vm53_vm1, %v33_v37 }
  0x38   :  { %729 = vmatprep.mubr.msk.f32.mxu0 %vm913_vm2, %v912_v0 }
  0x3b   :  { %730 = vmatmul.mubr.msk.f32.gmra.mrb[28].mxu0 %vm53_vm1, %v34_v38 }
  0x3c   :  { %732 = vmatprep.mubr.msk.f32.mxu0 %vm913_vm2, %v912_v0 }
  0x3f   :  { %733 = vmatmul.mubr.msk.f32.gmra.mrb[30].mxu0 %vm53_vm1, %v35_v39 }
  0x40   :  { %735 = vmatprep.mubr.msk.f32.mxu0 %vm913_vm2, %v912_v0 }
  0x43   :  { %736 = vmatmul.mubr.msk.f32.gmra.mrb[32].mxu0 %vm53_vm1, %v36_v40 }
  0x44   :  { %738 = vmatprep.mubr.msk.f32.mxu0 %vm913_vm2, %v912_v0 }
  0x47   :  { %739 = vmatmul.mubr.msk.f32.gmra.mrb[34].mxu0 %vm53_vm1, %v37_v41 }
  0x48   :  { %741 = vmatprep.mubr.msk.f32.mxu0 %vm913_vm2, %v912_v0 }
  0x4b   :  { %742 = vmatmul.mubr.msk.f32.gmra.mrb[36].mxu0 %vm53_vm1, %v38_v42 }
  0x4c   :  { %744 = vmatprep.mubr.msk.f32.mxu0 %vm913_vm2, %v912_v0 }
  0x4f   :  { %745 = vmatmul.mubr.msk.f32.gmra.mrb[38].mxu0 %vm53_vm1, %v39_v43 }
  0x50   :  { %747 = vmatprep.mubr.msk.f32.mxu0 %vm913_vm2, %v912_v0 }
  0x53   :  { %748 = vmatmul.mubr.msk.f32.gmra.mrb[40].mxu0 %vm53_vm1, %v40_v44 }
  0x54   :  { %750 = vmatprep.mubr.msk.f32.mxu0 %vm913_vm2, %v912_v0 }
  0x57   :  { %751 = vmatmul.mubr.msk.f32.gmra.mrb[42].mxu0 %vm53_vm1, %v41_v45 }
  0x58   :  { %753 = vmatprep.mubr.msk.f32.mxu0 %vm913_vm2, %v912_v0 }
  0x5b   :  { %754 = vmatmul.mubr.msk.f32.gmra.mrb[44].mxu0 %vm53_vm1, %v42_v49 }
  0x5c   :  { %756 = vmatprep.mubr.msk.f32.mxu0 %vm913_vm2, %v912_v0 }
  0x5f   :  { %757 = vmatmul.mubr.msk.f32.gmra.mrb[46].mxu0 %vm53_vm1, %v43_v50 }
  0x60   :  { %759 = vmatprep.mubr.msk.f32.mxu0 %vm913_vm2, %v912_v0 }
  0x63   :  { %760 = vmatmul.mubr.msk.f32.gmra.mrb[48].mxu0 %vm53_vm1, %v44_v51 }
  0x64   :  { %794 = vmatprep.mubr.msk.f32.mxu0 %vm913_vm2, %v912_v0 }
  0xd6   :  { %v199_v53 = vpop.f32.mrb[0].mxu0 }
  0xd7   :  { %v200_v54 = vadd.f32 %v1170_v52, %v199_v53  ;;  %v689_v55 = vpop.f32.mrb[1].mxu0 }
  0xd9   :  { %v323_v56 = vmax.f32 %v200_v54, 0.0 }
  0xda   :  { %v204_v57 = vpop.f32.mrb[2].mxu0 }
  0xdb   :  { %v205_v58 = vadd.f32 %v1170_v52, %v204_v57  ;;  %v692_v59 = vpop.f32.mrb[3].mxu0  ;;  %795 = vmatmul.mubr.f32.vlgmr.msra.gmra.mrb[50].mxu0 %v323_v56 }
  0xdc   :  { %797 = vmatprep.mubr.msk.f32.mxu0 %vm913_vm2, %v912_v0 }
  0xdd   :  { %v324_v60 = vmax.f32 %v205_v58, 0.0 }
  0xde   :  { %v209_v61 = vpop.f32.mrb[4].mxu0 }
  0xdf   :  { %v210_v62 = vadd.f32 %v1170_v52, %v209_v61  ;;  %v695_v63 = vpop.f32.mrb[5].mxu0  ;;  %798 = vmatmul.mubr.f32.gmra.mrb[52].mxu0 %v324_v60 }
  0xe0   :  { %800 = vmatprep.mubr.msk.f32.mxu0 %vm913_vm2, %v912_v0 }
  0xe1   :  { %v325_v1 = vmax.f32 %v210_v62, 0.0 }
  0xe2   :  { %v214_v2 = vpop.f32.mrb[6].mxu0 }
  0xe3   :  { %v215_v3 = vadd.f32 %v1170_v52, %v214_v2  ;;  %v698_v4 = vpop.f32.mrb[7].mxu0  ;;  %801 = vmatmul.mubr.f32.gmra.mrb[54].mxu0 %v325_v1 }
  0xe5   :  { %v326_v5 = vmax.f32 %v215_v3, 0.0 }
  0xe6   :  { %v219_v6 = vpop.f32.mrb[8].mxu0 }
  0xe7   :  { %v220_v7 = vadd.f32 %v1170_v52, %v219_v6  ;;  %v701_v8 = vpop.f32.mrb[9].mxu0  ;;  %804 = vmatmul.mubr.f32.vlgmr.msra.gmra.mrb[0].mxu1 %v326_v5 }
  0xe8   :  { %806 = vmatprep.mubr.msk.f32.mxu1 %vm913_vm2, %v912_v0 }
  0xe9   :  { %v327_v9 = vmax.f32 %v220_v7, 0.0 }
  0xea   :  { %v224_v10 = vpop.f32.mrb[10].mxu0 }
  0xeb   :  { %v225_v11 = vadd.f32 %v1170_v52, %v224_v10  ;;  %v704_v12 = vpop.f32.mrb[11].mxu0  ;;  %807 = vmatmul.mubr.f32.gmra.mrb[2].mxu1 %v327_v9 }
  0xec   :  { %809 = vmatprep.mubr.msk.f32.mxu1 %vm913_vm2, %v912_v0 }
  0xed   :  { %v328_v13 = vmax.f32 %v225_v11, 0.0 }
  0xee   :  { %v229_v14 = vpop.f32.mrb[12].mxu0 }
  0xef   :  { %v230_v15 = vadd.f32 %v1170_v52, %v229_v14  ;;  %v707_v16 = vpop.f32.mrb[13].mxu0  ;;  %810 = vmatmul.mubr.f32.gmra.mrb[4].mxu1 %v328_v13 }
  0xf0   :  { %812 = vmatprep.mubr.msk.f32.mxu1 %vm913_vm2, %v912_v0 }
  0xf1   :  { %v329_v17 = vmax.f32 %v230_v15, 0.0 }
  0xf2   :  { %v234_v18 = vpop.f32.mrb[14].mxu0 }
  0xf3   :  { %v235_v19 = vadd.f32 %v1170_v52, %v234_v18  ;;  %v710_v20 = vpop.f32.mrb[15].mxu0  ;;  %813 = vmatmul.mubr.f32.gmra.mrb[6].mxu1 %v329_v17 }
  0xf4   :  { %815 = vmatprep.mubr.msk.f32.mxu1 %vm913_vm2, %v912_v0 }
  0xf5   :  { %v330_v21 = vmax.f32 %v235_v19, 0.0 }
  0xf6   :  { %v239_v22 = vpop.f32.mrb[16].mxu0 }
  0xf7   :  { %v240_v23 = vadd.f32 %v1170_v52, %v239_v22  ;;  %v713_v24 = vpop.f32.mrb[17].mxu0  ;;  %816 = vmatmul.mubr.f32.gmra.mrb[8].mxu1 %v330_v21 }
  0xf8   :  { %818 = vmatprep.mubr.msk.f32.mxu1 %vm913_vm2, %v912_v0 }
  0xf9   :  { %v331_v25 = vmax.f32 %v240_v23, 0.0 }
  0xfa   :  { %v244_v26 = vpop.f32.mrb[18].mxu0 }
  0xfb   :  { %v245_v27 = vadd.f32 %v1170_v52, %v244_v26  ;;  %v716_v28 = vpop.f32.mrb[19].mxu0  ;;  %819 = vmatmul.mubr.f32.gmra.mrb[10].mxu1 %v331_v25 }
  0xfc   :  { %821 = vmatprep.mubr.msk.f32.mxu1 %vm913_vm2, %v912_v0  ;;  %v1246_v28 = vld [vmem:[%s1352_s4] ss:$0 sm:$0xff] }
  0xfd   :  { %v332_v29 = vmax.f32 %v245_v27, 0.0 }
  0xfe   :  { %v249_v30 = vpop.f32.mrb[20].mxu0 }
  0xff   :  { %v250_v31 = vadd.f32 %v1170_v52, %v249_v30  ;;  %v719_v32 = vpop.f32.mrb[21].mxu0  ;;  %822 = vmatmul.mubr.f32.gmra.mrb[12].mxu1 %v332_v29 }
 0x100   :  { %824 = vmatprep.mubr.msk.f32.mxu1 %vm913_vm2, %v912_v0 }
 0x101   :  { %v333_v33 = vmax.f32 %v250_v31, 0.0 }
 0x102   :  { %v254_v34 = vpop.f32.mrb[22].mxu0 }
 0x103   :  { %v255_v35 = vadd.f32 %v1170_v52, %v254_v34  ;;  %v722_v36 = vpop.f32.mrb[23].mxu0  ;;  %825 = vmatmul.mubr.f32.gmra.mrb[14].mxu1 %v333_v33 }
 0x104   :  { %827 = vmatprep.mubr.msk.f32.mxu1 %vm913_vm2, %v912_v0 }
 0x105   :  { %v334_v37 = vmax.f32 %v255_v35, 0.0 }
 0x106   :  { %v259_v38 = vpop.f32.mrb[24].mxu0 }
 0x107   :  { %v260_v39 = vadd.f32 %v1170_v52, %v259_v38  ;;  %v725_v40 = vpop.f32.mrb[25].mxu0  ;;  %828 = vmatmul.mubr.f32.gmra.mrb[16].mxu1 %v334_v37 }
 0x108   :  { %830 = vmatprep.mubr.msk.f32.mxu1 %vm913_vm2, %v912_v0 }
 0x109   :  { %v335_v41 = vmax.f32 %v260_v39, 0.0 }
 0x10a   :  { %v264_v42 = vpop.f32.mrb[26].mxu0 }
 0x10b   :  { %v265_v43 = vadd.f32 %v1170_v52, %v264_v42  ;;  %v728_v44 = vpop.f32.mrb[27].mxu0  ;;  %831 = vmatmul.mubr.f32.gmra.mrb[18].mxu1 %v335_v41 }
 0x10c   :  { %833 = vmatprep.mubr.msk.f32.mxu1 %vm913_vm2, %v912_v0 }
 0x10d   :  { %v336_v45 = vmax.f32 %v265_v43, 0.0 }
 0x10e   :  { %v269_v46 = vpop.f32.mrb[28].mxu0 }
 0x10f   :  { %v270_v47 = vadd.f32 %v1170_v52, %v269_v46  ;;  %v731_v48 = vpop.f32.mrb[29].mxu0  ;;  %834 = vmatmul.mubr.f32.gmra.mrb[20].mxu1 %v336_v45 }
 0x110   :  { %836 = vmatprep.mubr.msk.f32.mxu1 %vm913_vm2, %v912_v0 }
 0x111   :  { %v337_v49 = vmax.f32 %v270_v47, 0.0 }
 0x112   :  { %v274_v50 = vpop.f32.mrb[30].mxu0 }
 0x113   :  { %v275_v51 = vadd.f32 %v1170_v52, %v274_v50  ;;  %v734_v53 = vpop.f32.mrb[31].mxu0  ;;  %837 = vmatmul.mubr.f32.gmra.mrb[22].mxu1 %v337_v49 }
 0x114   :  { %839 = vmatprep.mubr.msk.f32.mxu1 %vm913_vm2, %v912_v0 }
 0x115   :  { %v338_v54 = vmax.f32 %v275_v51, 0.0 }
 0x116   :  { %v279_v55 = vpop.f32.mrb[32].mxu0 }
 0x117   :  { %v280_v56 = vadd.f32 %v1170_v52, %v279_v55  ;;  %v737_v57 = vpop.f32.mrb[33].mxu0  ;;  %840 = vmatmul.mubr.f32.gmra.mrb[24].mxu1 %v338_v54 }
 0x118   :  { %842 = vmatprep.mubr.msk.f32.mxu1 %vm913_vm2, %v912_v0 }
 0x119   :  { %v339_v58 = vmax.f32 %v280_v56, 0.0 }
 0x11a   :  { %v284_v59 = vpop.f32.mrb[34].mxu0 }
 0x11b   :  { %v285_v60 = vadd.f32 %v1170_v52, %v284_v59  ;;  %v740_v61 = vpop.f32.mrb[35].mxu0  ;;  %843 = vmatmul.mubr.f32.gmra.mrb[26].mxu1 %v339_v58 }
 0x11c   :  { %845 = vmatprep.mubr.msk.f32.mxu1 %vm913_vm2, %v912_v0 }
 0x11d   :  { %v340_v62 = vmax.f32 %v285_v60, 0.0 }
 0x11e   :  { %v289_v63 = vpop.f32.mrb[36].mxu0 }
 0x11f   :  { %v290_v1 = vadd.f32 %v1170_v52, %v289_v63  ;;  %v743_v2 = vpop.f32.mrb[37].mxu0  ;;  %846 = vmatmul.mubr.f32.gmra.mrb[28].mxu1 %v340_v62 }
 0x120   :  { %848 = vmatprep.mubr.msk.f32.mxu1 %vm913_vm2, %v912_v0 }
 0x121   :  { %v341_v3 = vmax.f32 %v290_v1, 0.0 }
 0x122   :  { %v294_v4 = vpop.f32.mrb[38].mxu0 }
 0x123   :  { %v295_v5 = vadd.f32 %v1170_v52, %v294_v4  ;;  %v746_v6 = vpop.f32.mrb[39].mxu0  ;;  %849 = vmatmul.mubr.f32.gmra.mrb[30].mxu1 %v341_v3 }
 0x124   :  { %851 = vmatprep.mubr.msk.f32.mxu1 %vm913_vm2, %v912_v0 }
 0x125   :  { %v342_v7 = vmax.f32 %v295_v5, 0.0 }
 0x126   :  { %v299_v8 = vpop.f32.mrb[40].mxu0 }
 0x127   :  { %v300_v9 = vadd.f32 %v1170_v52, %v299_v8  ;;  %v749_v10 = vpop.f32.mrb[41].mxu0  ;;  %852 = vmatmul.mubr.f32.gmra.mrb[32].mxu1 %v342_v7 }
 0x128   :  { %854 = vmatprep.mubr.msk.f32.mxu1 %vm913_vm2, %v912_v0 }
 0x129   :  { %v343_v11 = vmax.f32 %v300_v9, 0.0 }
 0x12a   :  { %v304_v12 = vpop.f32.mrb[42].mxu0 }
 0x12b   :  { %v305_v13 = vadd.f32 %v1170_v52, %v304_v12  ;;  %v752_v14 = vpop.f32.mrb[43].mxu0  ;;  %855 = vmatmul.mubr.f32.gmra.mrb[34].mxu1 %v343_v11 }
 0x12c   :  { %857 = vmatprep.mubr.msk.f32.mxu1 %vm913_vm2, %v912_v0 }
 0x12d   :  { %v344_v15 = vmax.f32 %v305_v13, 0.0 }
 0x12e   :  { %v309_v16 = vpop.f32.mrb[44].mxu0 }
 0x12f   :  { %v310_v17 = vadd.f32 %v1170_v52, %v309_v16  ;;  %v755_v18 = vpop.f32.mrb[45].mxu0  ;;  %858 = vmatmul.mubr.f32.gmra.mrb[36].mxu1 %v344_v15 }
 0x130   :  { %860 = vmatprep.mubr.msk.f32.mxu1 %vm913_vm2, %v912_v0 }
 0x131   :  { %v345_v19 = vmax.f32 %v310_v17, 0.0 }
 0x132   :  { %v314_v20 = vpop.f32.mrb[46].mxu0 }
 0x133   :  { %v315_v21 = vadd.f32 %v1170_v52, %v314_v20  ;;  %v758_v22 = vpop.f32.mrb[47].mxu0  ;;  %861 = vmatmul.mubr.f32.gmra.mrb[38].mxu1 %v345_v19 }
 0x134   :  { %863 = vmatprep.mubr.msk.f32.mxu1 %vm913_vm2, %v912_v0 }
 0x135   :  { %v346_v23 = vmax.f32 %v315_v21, 0.0 }
 0x136   :  { %v319_v24 = vpop.f32.mrb[48].mxu0 }
 0x137   :  { %v320_v25 = vadd.f32 %v1170_v52, %v319_v24  ;;  %v761_v26 = vpop.f32.mrb[49].mxu0  ;;  %864 = vmatmul.mubr.f32.gmra.mrb[40].mxu1 %v346_v23 }
 0x138   :  { %866 = vmatprep.mubr.msk.f32.mxu1 %vm913_vm2, %v912_v0 }
 0x139   :  { %v347_v27 = vmax.f32 %v320_v25, 0.0 }
 0x13b   :  { %867 = vmatmul.mubr.f32.gmra.mrb[42].mxu1 %v347_v27 }
 0x1ae   :  { %v437_v29 = vpop.f32.mrb[50].mxu0 }
 0x1af   :  { %v438_v30 = vadd.f32 %v1246_v28, %v437_v29  ;;  %v796_v31 = vpop.f32.mrb[51].mxu0 }
 0x1b1   :  { %561 = vst [vmem:[%s1353_s5] sm:$0xff] %v438_v30 }
 0x1b2   :  { %v442_v52 = vpop.f32.mrb[52].mxu0 }
 0x1b3   :  { %v443_v32 = vadd.f32 %v1246_v28, %v442_v52  ;;  %v799_v33 = vpop.f32.mrb[53].mxu0 }
 0x1b5   :  { %562 = vst [vmem:[%s1353_s5 + $0x8] sm:$0xff] %v443_v32 }
 0x1b6   :  { %v447_v0 = vpop.f32.mrb[54].mxu0 }
 0x1b7   :  { %v448_v34 = vadd.f32 %v1246_v28, %v447_v0  ;;  %v802_v35 = vpop.f32.mrb[55].mxu0 }
 0x1b9   :  { %563 = vst [vmem:[%s1353_s5 + $0x10] sm:$0xff] %v448_v34 }
 0x1ba   :  { %v452_v36 = vpop.f32.mrb[0].mxu1 }
 0x1bb   :  { %v453_v37 = vadd.f32 %v1246_v28, %v452_v36  ;;  %v805_v38 = vpop.f32.mrb[1].mxu1 }
 0x1bd   :  { %564 = vst [vmem:[%s1353_s5 + $0x18] sm:$0xff] %v453_v37 }
 0x1be   :  { %v457_v39 = vpop.f32.mrb[2].mxu1 }
 0x1bf   :  { %v458_v40 = vadd.f32 %v1246_v28, %v457_v39  ;;  %v808_v41 = vpop.f32.mrb[3].mxu1 }
 0x1c1   :  { %565 = vst [vmem:[%s1353_s5 + $0x20] sm:$0xff] %v458_v40 }
 0x1c2   :  { %v462_v42 = vpop.f32.mrb[4].mxu1 }
 0x1c3   :  { %v463_v43 = vadd.f32 %v1246_v28, %v462_v42  ;;  %v811_v44 = vpop.f32.mrb[5].mxu1 }
 0x1c5   :  { %566 = vst [vmem:[%s1353_s5 + $0x28] sm:$0xff] %v463_v43 }
 0x1c6   :  { %v467_v45 = vpop.f32.mrb[6].mxu1 }
 0x1c7   :  { %v468_v46 = vadd.f32 %v1246_v28, %v467_v45  ;;  %v814_v47 = vpop.f32.mrb[7].mxu1 }
 0x1c9   :  { %567 = vst [vmem:[%s1353_s5 + $0x30] sm:$0xff] %v468_v46 }
 0x1ca   :  { %v472_v48 = vpop.f32.mrb[8].mxu1 }
 0x1cb   :  { %v473_v49 = vadd.f32 %v1246_v28, %v472_v48  ;;  %v817_v50 = vpop.f32.mrb[9].mxu1 }
 0x1cd   :  { %568 = vst [vmem:[%s1353_s5 + $0x38] sm:$0xff] %v473_v49 }
 0x1ce   :  { %v477_v51 = vpop.f32.mrb[10].mxu1 }
 0x1cf   :  { %v478_v53 = vadd.f32 %v1246_v28, %v477_v51  ;;  %v820_v54 = vpop.f32.mrb[11].mxu1 }
 0x1d1   :  { %569 = vst [vmem:[%s1353_s5 + $0x40] sm:$0xff] %v478_v53 }
 0x1d2   :  { %v482_v55 = vpop.f32.mrb[12].mxu1 }
 0x1d3   :  { %v483_v56 = vadd.f32 %v1246_v28, %v482_v55  ;;  %v823_v57 = vpop.f32.mrb[13].mxu1 }
 0x1d5   :  { %570 = vst [vmem:[%s1353_s5 + $0x48] sm:$0xff] %v483_v56 }
 0x1d6   :  { %v487_v58 = vpop.f32.mrb[14].mxu1 }
 0x1d7   :  { %v488_v59 = vadd.f32 %v1246_v28, %v487_v58  ;;  %v826_v60 = vpop.f32.mrb[15].mxu1 }
 0x1d9   :  { %571 = vst [vmem:[%s1353_s5 + $0x50] sm:$0xff] %v488_v59 }
 0x1da   :  { %v492_v61 = vpop.f32.mrb[16].mxu1 }
 0x1db   :  { %v493_v62 = vadd.f32 %v1246_v28, %v492_v61  ;;  %v829_v63 = vpop.f32.mrb[17].mxu1 }
 0x1dd   :  { %572 = vst [vmem:[%s1353_s5 + $0x58] sm:$0xff] %v493_v62 }
 0x1de   :  { %v497_v1 = vpop.f32.mrb[18].mxu1 }
 0x1df   :  { %v498_v2 = vadd.f32 %v1246_v28, %v497_v1  ;;  %v832_v3 = vpop.f32.mrb[19].mxu1 }
 0x1e1   :  { %573 = vst [vmem:[%s1353_s5 + $0x60] sm:$0xff] %v498_v2 }
 0x1e2   :  { %v502_v4 = vpop.f32.mrb[20].mxu1 }
 0x1e3   :  { %v503_v5 = vadd.f32 %v1246_v28, %v502_v4  ;;  %v835_v6 = vpop.f32.mrb[21].mxu1 }
 0x1e5   :  { %574 = vst [vmem:[%s1353_s5 + $0x68] sm:$0xff] %v503_v5 }
 0x1e6   :  { %v507_v7 = vpop.f32.mrb[22].mxu1 }
 0x1e7   :  { %v508_v8 = vadd.f32 %v1246_v28, %v507_v7  ;;  %v838_v9 = vpop.f32.mrb[23].mxu1 }
 0x1e9   :  { %575 = vst [vmem:[%s1353_s5 + $0x70] sm:$0xff] %v508_v8 }
 0x1ea   :  { %v512_v10 = vpop.f32.mrb[24].mxu1 }
 0x1eb   :  { %v513_v11 = vadd.f32 %v1246_v28, %v512_v10  ;;  %v841_v12 = vpop.f32.mrb[25].mxu1 }
 0x1ed   :  { %576 = vst [vmem:[%s1353_s5 + $0x78] sm:$0xff] %v513_v11 }
 0x1ee   :  { %v517_v13 = vpop.f32.mrb[26].mxu1 }
 0x1ef   :  { %v518_v14 = vadd.f32 %v1246_v28, %v517_v13  ;;  %v844_v15 = vpop.f32.mrb[27].mxu1 }
 0x1f1   :  { %577 = vst [vmem:[%s1353_s5 + $0x80] sm:$0xff] %v518_v14 }
 0x1f2   :  { %v522_v16 = vpop.f32.mrb[28].mxu1 }
 0x1f3   :  { %v523_v17 = vadd.f32 %v1246_v28, %v522_v16  ;;  %v847_v18 = vpop.f32.mrb[29].mxu1 }
 0x1f5   :  { %578 = vst [vmem:[%s1353_s5 + $0x88] sm:$0xff] %v523_v17 }
 0x1f6   :  { %v527_v19 = vpop.f32.mrb[30].mxu1 }
 0x1f7   :  { %v528_v20 = vadd.f32 %v1246_v28, %v527_v19  ;;  %v850_v21 = vpop.f32.mrb[31].mxu1 }
 0x1f9   :  { %579 = vst [vmem:[%s1353_s5 + $0x90] sm:$0xff] %v528_v20 }
 0x1fa   :  { %v532_v22 = vpop.f32.mrb[32].mxu1 }
 0x1fb   :  { %v533_v23 = vadd.f32 %v1246_v28, %v532_v22  ;;  %v853_v24 = vpop.f32.mrb[33].mxu1 }
 0x1fd   :  { %580 = vst [vmem:[%s1353_s5 + $0x98] sm:$0xff] %v533_v23 }
 0x1fe   :  { %v537_v25 = vpop.f32.mrb[34].mxu1 }
 0x1ff   :  { %v538_v26 = vadd.f32 %v1246_v28, %v537_v25  ;;  %v856_v27 = vpop.f32.mrb[35].mxu1 }
 0x201   :  { %581 = vst [vmem:[%s1353_s5 + $0xa0] sm:$0xff] %v538_v26 }
 0x202   :  { %v542_v29 = vpop.f32.mrb[36].mxu1 }
 0x203   :  { %v543_v30 = vadd.f32 %v1246_v28, %v542_v29  ;;  %v859_v31 = vpop.f32.mrb[37].mxu1 }
 0x205   :  { %582 = vst [vmem:[%s1353_s5 + $0xa8] sm:$0xff] %v543_v30 }
 0x206   :  { %v547_v52 = vpop.f32.mrb[38].mxu1 }
 0x207   :  { %v548_v32 = vadd.f32 %v1246_v28, %v547_v52  ;;  %v862_v33 = vpop.f32.mrb[39].mxu1 }
 0x209   :  { %583 = vst [vmem:[%s1353_s5 + $0xb0] sm:$0xff] %v548_v32 }
 0x20a   :  { %v552_v0 = vpop.f32.mrb[40].mxu1 }
 0x20b   :  { %v553_v34 = vadd.f32 %v1246_v28, %v552_v0  ;;  %v865_v35 = vpop.f32.mrb[41].mxu1 }
 0x20d   :  { %584 = vst [vmem:[%s1353_s5 + $0xb8] sm:$0xff] %v553_v34 }
 0x20e   :  { %v557_v36 = vpop.f32.mrb[42].mxu1 }
 0x20f   :  { %v558_v37 = vadd.f32 %v1246_v28, %v557_v36  ;;  %v868_v38 = vpop.f32.mrb[43].mxu1 }
 0x211   :  { %585 = vst [vmem:[%s1353_s5 + $0xc0] sm:$0xff] %v558_v37 }

</bundles_post_ra>
